<compile_context>
chip_gen: v6e
topology: v6e:2x2x1
jax: 0.10.0
libtpu: 0.0.40
codegen_flags: <defaults>
</compile_context>

<pallas_src>
import jax
import jax.numpy as jnp
from jax.experimental import pallas as pl
from jax.experimental.pallas import tpu as pltpu

LANE = 128


def _round_up(a, m):
    return (a + m - 1) // m * m


def regret_net_kernel(x_ref, w1_ref, b1_ref, w2_ref, b2_ref, w3_ref, b3_ref, o_ref):
    # fc1 + ReLU  (bf16 MXU operands, f32 accumulation; bias/ReLU in f32 on VPU)
    h1 = jnp.dot(x_ref[...].astype(jnp.bfloat16), w1_ref[...],
                 preferred_element_type=jnp.float32)
    h1 = jnp.maximum(h1 + b1_ref[...], 0.0)
    # fc2 + ReLU
    h2 = jnp.dot(h1.astype(jnp.bfloat16), w2_ref[...],
                 preferred_element_type=jnp.float32)
    h2 = jnp.maximum(h2 + b2_ref[...], 0.0)
    # fc_out: lane-dense (128-wide) MXU op, then store only the narrow useful columns.
    out = jnp.dot(h2.astype(jnp.bfloat16), w3_ref[...],
                  preferred_element_type=jnp.float32) + b3_ref[...]
    o_ref[...] = out[:, : o_ref.shape[-1]].astype(o_ref.dtype)


def prepare_params(params):
    """One-time formatting of weights for the kernel (hoisted out of the forward path)."""
    out_dim = params["w3"].shape[1]
    w3_pad = LANE  # zero-pad fc_out columns to 128 so the last matmul is lane-dense
    return {
        "w1": params["w1"].astype(jnp.bfloat16),
        "b1": params["b1"].astype(jnp.float32),
        "w2": params["w2"].astype(jnp.bfloat16),
        "b2": params["b2"].astype(jnp.float32),
        "w3": jnp.pad(params["w3"], ((0, 0), (0, w3_pad - out_dim))).astype(jnp.bfloat16),
        "b3": jnp.pad(params["b3"], ((0, 0), (0, w3_pad - out_dim))).astype(jnp.float32),
        "out_dim": out_dim,
    }


def regret_net_forward(x, p, *, tile_b=2048):
    """x: (B, input_dim) float32.  p: prepare_params(...) output."""
    B, in_dim = x.shape
    H = p["w1"].shape[1]
    out_dim = p["out_dim"]
    w3_pad = p["w3"].shape[1]                      # 128 (lane-dense MXU operand)
    out_store = max(8, _round_up(out_dim, 8))      # narrow f32 writeback columns

    # Batch tile: multiple of 256, no bigger than needed, and >=2 grid steps when the
    # batch allows it (v7x has 2 TensorCores; "parallel" only helps with >=2 steps).
    tb = max(256, min(_round_up(tile_b, 256), _round_up(B, 256)))
    if B >= 512 and pl.cdiv(B, tb) < 2:
        tb = max(256, _round_up(pl.cdiv(B, 2), 256))
    num_tiles = pl.cdiv(B, tb)                     # ragged last block handled by Pallas

    flops = 2 * num_tiles * tb * (in_dim * H + H * H + H * w3_pad)
    bytes_accessed = (
        x.size * 4
        + (p["w1"].size + p["w2"].size + p["w3"].size) * 2
        + (p["b1"].size + p["b2"].size + p["b3"].size) * 4
        + B * out_store * 4
    )

    out = pl.pallas_call(
        regret_net_kernel,
        out_shape=jax.ShapeDtypeStruct((B, out_store), jnp.float32),
        grid=(num_tiles,),
        in_specs=[
            pl.BlockSpec((tb, in_dim), lambda i: (i, 0)),      # x tile per step
            pl.BlockSpec((in_dim, H), lambda i: (0, 0)),       # w1 (VMEM-resident)
            pl.BlockSpec((1, H), lambda i: (0, 0)),            # b1 (resident)
            pl.BlockSpec((H, H), lambda i: (0, 0)),            # w2 (resident)
            pl.BlockSpec((1, H), lambda i: (0, 0)),            # b2 (resident)
            pl.BlockSpec((H, w3_pad), lambda i: (0, 0)),       # w3 (resident, 128-padded)
            pl.BlockSpec((1, w3_pad), lambda i: (0, 0)),       # b3 (resident, 128-padded)
        ],
        out_specs=pl.BlockSpec((tb, out_store), lambda i: (i, 0)),
        compiler_params=pltpu.CompilerParams(
            dimension_semantics=("parallel",),
            vmem_limit_bytes=32 * 1024 * 1024),
        cost_estimate=pl.CostEstimate(
            flops=flops, transcendentals=0, bytes_accessed=bytes_accessed),
    )(x, p["w1"], p["b1"], p["w2"], p["b2"], p["w3"], p["b3"])

    # Drop the (narrow) zero-padded columns; no batch padding was added.
    return out[:, :out_dim]


def init_params(key, input_dim, hidden=128, output_dim=3):
    """Deterministic init mimicking PyTorch nn.Linear default (U(-1/sqrt(fan_in), +))."""
    ks = jax.random.split(key, 6)

    def linear(kw, kb, fan_in, fan_out):
        bound = 1.0 / jnp.sqrt(jnp.float32(fan_in))
        # stored as (in, out) == PyTorch weight.T
        w = jax.random.uniform(kw, (fan_in, fan_out), jnp.float32, -bound, bound)
        b = jax.random.uniform(kb, (1, fan_out), jnp.float32, -bound, bound)
        return w, b

    w1, b1 = linear(ks[0], ks[1], input_dim, hidden)
    w2, b2 = linear(ks[2], ks[3], hidden, hidden)
    w3, b3 = linear(ks[4], ks[5], hidden, output_dim)
    return {"w1": w1, "b1": b1, "w2": w2, "b2": b2, "w3": w3, "b3": b3}


def reference_forward_f32(x, p):
    h1 = jnp.maximum(x @ p["w1"] + p["b1"], 0.0)
    h2 = jnp.maximum(h1 @ p["w2"] + p["b2"], 0.0)
    return h2 @ p["w3"] + p["b3"]


def reference_forward_bf16(x, p):
    """Reference with the same bf16-operand / f32-accumulate numerics as the kernel."""
    bf = jnp.bfloat16
    h1 = jnp.maximum(
        jnp.dot(x.astype(bf), p["w1"].astype(bf),
                preferred_element_type=jnp.float32) + p["b1"], 0.0)
    h2 = jnp.maximum(
        jnp.dot(h1.astype(bf), p["w2"].astype(bf),
                preferred_element_type=jnp.float32) + p["b2"], 0.0)
    return jnp.dot(h2.astype(bf), p["w3"].astype(bf),
                   preferred_element_type=jnp.float32) + p["b3"]


if __name__ == "__main__":
    key = jax.random.PRNGKey(0)
    k_x, k_p = jax.random.split(key)

    batch, input_dim, output_dim = 2, 32, 3
    x = jax.random.normal(k_x, (batch, input_dim), jnp.float32)
    params = init_params(k_p, input_dim, hidden=128, output_dim=output_dim)
    prepared = prepare_params(params)   # one-time weight formatting (bf16 / lane padding)

    out = regret_net_forward(x, prepared)
    out = jax.block_until_ready(out)

    assert out.shape == (batch, output_dim)

    ref_bf16 = reference_forward_bf16(x, params)
    ref_f32 = reference_forward_f32(x, params)
    # Tight check against a bf16-matched reference, coarse check against pure f32.
    assert jnp.allclose(out, ref_bf16, atol=2e-3, rtol=2e-3)
    assert jnp.allclose(out, ref_f32, atol=5e-2, rtol=5e-2)

    print("KERNEL_OK")
</pallas_src>

<mosaic_0001>
module attributes {stable_mosaic.version = 11 : i64} {
  func.func @regret_net_kernel(%arg0: i32, %arg1: memref<256x32xf32, #tpu.memory_space<vmem>>, %arg2: memref<32x128xbf16, #tpu.memory_space<vmem>>, %arg3: memref<1x128xf32, #tpu.memory_space<vmem>>, %arg4: memref<128x128xbf16, #tpu.memory_space<vmem>>, %arg5: memref<1x128xf32, #tpu.memory_space<vmem>>, %arg6: memref<128x128xbf16, #tpu.memory_space<vmem>>, %arg7: memref<1x128xf32, #tpu.memory_space<vmem>>, %arg8: memref<256x8xf32, #tpu.memory_space<vmem>>) attributes {dimension_semantics = [#tpu.dimension_semantics<parallel>], iteration_bounds = array<i64: 1>, scalar_prefetch = 0 : i64, scratch_operands = 0 : i64, tpu.core_type = #tpu.core_type<tc>, window_params = [{transform_indices = @transform_0, window_bounds = array<i64: 256, 32>}, {pipeline_mode = #tpu.pipeline_mode<synchronous>, transform_indices = @transform_1, window_bounds = array<i64: 32, 128>}, {pipeline_mode = #tpu.pipeline_mode<synchronous>, transform_indices = @transform_2, window_bounds = array<i64: 1, 128>}, {pipeline_mode = #tpu.pipeline_mode<synchronous>, transform_indices = @transform_3, window_bounds = array<i64: 128, 128>}, {pipeline_mode = #tpu.pipeline_mode<synchronous>, transform_indices = @transform_4, window_bounds = array<i64: 1, 128>}, {pipeline_mode = #tpu.pipeline_mode<synchronous>, transform_indices = @transform_5, window_bounds = array<i64: 128, 128>}, {pipeline_mode = #tpu.pipeline_mode<synchronous>, transform_indices = @transform_6, window_bounds = array<i64: 1, 128>}, {transform_indices = @transform_7, window_bounds = array<i64: 256, 8>}]} {
    %c0 = arith.constant 0 : index
    %c0_0 = arith.constant 0 : index
    %0 = vector.load %arg1[%c0, %c0_0] : memref<256x32xf32, #tpu.memory_space<vmem>>, vector<256x32xf32>
    %1 = arith.truncf %0 : vector<256x32xf32> to vector<256x32xbf16>
    %c0_1 = arith.constant 0 : index
    %c0_2 = arith.constant 0 : index
    %2 = vector.load %arg2[%c0_1, %c0_2] : memref<32x128xbf16, #tpu.memory_space<vmem>>, vector<32x128xbf16>
    %cst = arith.constant dense<0.000000e+00> : vector<256x128xf32>
    %3 = tpu.matmul %1, %2, %cst {dimension_numbers = #tpu.dot_dimension_numbers<[1], [0], [0], [1], [0, 0, 1, 1], [], []>} : vector<256x32xbf16>, vector<32x128xbf16>, vector<256x128xf32> -> vector<256x128xf32>
    %c0_3 = arith.constant 0 : index
    %c0_4 = arith.constant 0 : index
    %4 = vector.load %arg3[%c0_3, %c0_4] : memref<1x128xf32, #tpu.memory_space<vmem>>, vector<1x128xf32>
    %5 = vector.broadcast %4 : vector<1x128xf32> to vector<256x128xf32>
    %6 = arith.addf %3, %5 : vector<256x128xf32>
    %cst_5 = arith.constant 0.000000e+00 : f32
    %7 = vector.broadcast %cst_5 : f32 to vector<256x128xf32>
    %8 = arith.maximumf %6, %7 : vector<256x128xf32>
    %9 = arith.truncf %8 : vector<256x128xf32> to vector<256x128xbf16>
    %c0_6 = arith.constant 0 : index
    %c0_7 = arith.constant 0 : index
    %10 = vector.load %arg4[%c0_6, %c0_7] : memref<128x128xbf16, #tpu.memory_space<vmem>>, vector<128x128xbf16>
    %cst_8 = arith.constant dense<0.000000e+00> : vector<256x128xf32>
    %11 = tpu.matmul %9, %10, %cst_8 {dimension_numbers = #tpu.dot_dimension_numbers<[1], [0], [0], [1], [0, 0, 1, 1], [], []>} : vector<256x128xbf16>, vector<128x128xbf16>, vector<256x128xf32> -> vector<256x128xf32>
    %c0_9 = arith.constant 0 : index
    %c0_10 = arith.constant 0 : index
    %12 = vector.load %arg5[%c0_9, %c0_10] : memref<1x128xf32, #tpu.memory_space<vmem>>, vector<1x128xf32>
    %13 = vector.broadcast %12 : vector<1x128xf32> to vector<256x128xf32>
    %14 = arith.addf %11, %13 : vector<256x128xf32>
    %cst_11 = arith.constant 0.000000e+00 : f32
    %15 = vector.broadcast %cst_11 : f32 to vector<256x128xf32>
    %16 = arith.maximumf %14, %15 : vector<256x128xf32>
    %17 = arith.truncf %16 : vector<256x128xf32> to vector<256x128xbf16>
    %c0_12 = arith.constant 0 : index
    %c0_13 = arith.constant 0 : index
    %18 = vector.load %arg6[%c0_12, %c0_13] : memref<128x128xbf16, #tpu.memory_space<vmem>>, vector<128x128xbf16>
    %cst_14 = arith.constant dense<0.000000e+00> : vector<256x128xf32>
    %19 = tpu.matmul %17, %18, %cst_14 {dimension_numbers = #tpu.dot_dimension_numbers<[1], [0], [0], [1], [0, 0, 1, 1], [], []>} : vector<256x128xbf16>, vector<128x128xbf16>, vector<256x128xf32> -> vector<256x128xf32>
    %c0_15 = arith.constant 0 : index
    %c0_16 = arith.constant 0 : index
    %20 = vector.load %arg7[%c0_15, %c0_16] : memref<1x128xf32, #tpu.memory_space<vmem>>, vector<1x128xf32>
    %21 = vector.broadcast %20 : vector<1x128xf32> to vector<256x128xf32>
    %22 = arith.addf %19, %21 : vector<256x128xf32>
    %23 = vector.extract_strided_slice %22 {offsets = [0, 0], sizes = [256, 8], strides = [1, 1]} : vector<256x128xf32> to vector<256x8xf32>
    %c0_17 = arith.constant 0 : index
    %c0_18 = arith.constant 0 : index
    %24 = vector.load %arg8[%c0_17, %c0_18] : memref<256x8xf32, #tpu.memory_space<vmem>>, vector<256x8xf32>
    tpu.vector_store %arg8[%c0_17, %c0_18], %23 {strides = array<i32>} : memref<256x8xf32, #tpu.memory_space<vmem>>, vector<256x8xf32>,
    return
  }
  func.func @transform_0(%arg0: i32) -> (i32, i32) {
    %c0_i32 = arith.constant 0 : i32
    %c0_i32_0 = arith.constant 0 : i32
    return %arg0, %c0_i32 : i32, i32
  }
  func.func @transform_1(%arg0: i32) -> (i32, i32) {
    %c0_i32 = arith.constant 0 : i32
    %c0_i32_0 = arith.constant 0 : i32
    %c0_i32_1 = arith.constant 0 : i32
    return %c0_i32, %c0_i32_0 : i32, i32
  }
  func.func @transform_2(%arg0: i32) -> (i32, i32) {
    %c0_i32 = arith.constant 0 : i32
    %c0_i32_0 = arith.constant 0 : i32
    %c0_i32_1 = arith.constant 0 : i32
    return %c0_i32, %c0_i32_0 : i32, i32
  }
  func.func @transform_3(%arg0: i32) -> (i32, i32) {
    %c0_i32 = arith.constant 0 : i32
    %c0_i32_0 = arith.constant 0 : i32
    %c0_i32_1 = arith.constant 0 : i32
    return %c0_i32, %c0_i32_0 : i32, i32
  }
  func.func @transform_4(%arg0: i32) -> (i32, i32) {
    %c0_i32 = arith.constant 0 : i32
    %c0_i32_0 = arith.constant 0 : i32
    %c0_i32_1 = arith.constant 0 : i32
    return %c0_i32, %c0_i32_0 : i32, i32
  }
  func.func @transform_5(%arg0: i32) -> (i32, i32) {
    %c0_i32 = arith.constant 0 : i32
    %c0_i32_0 = arith.constant 0 : i32
    %c0_i32_1 = arith.constant 0 : i32
    return %c0_i32, %c0_i32_0 : i32, i32
  }
  func.func @transform_6(%arg0: i32) -> (i32, i32) {
    %c0_i32 = arith.constant 0 : i32
    %c0_i32_0 = arith.constant 0 : i32
    %c0_i32_1 = arith.constant 0 : i32
    return %c0_i32, %c0_i32_0 : i32, i32
  }
  func.func @transform_7(%arg0: i32) -> (i32, i32) {
    %c0_i32 = arith.constant 0 : i32
    %c0_i32_0 = arith.constant 0 : i32
    return %arg0, %c0_i32 : i32, i32
  }
}

</mosaic_0001>

<bundles_post_ra>
// kernel: tpu_custom_call.1
= control target key start
LH: loop header
LB: loop body
LE: loop exit
PB: predicated region body
PF: predicated region fallthrough
CT: control target
= control target key end

     0   :  { %12 = vsyncpa [#allocation3], 0  ;;  %s1603_s0 = inlined_call_operand.hbm [shape: f32[2,32], index: 0, kind: input, shape index: {}]   ;;  %s1604_s1 = inlined_call_operand.hbm [shape: bf16[32,128], index: 1, kind: input, shape index: {}]   ;;  %s1605_s2 = inlined_call_operand.vmem [shape: f32[1,128], index: 2, kind: input, shape index: {}]   ;;  %s1606_s3 = inlined_call_operand.hbm [shape: bf16[128,128], index: 3, kind: input, shape index: {}]   ;;  %s1607_s4 = inlined_call_operand.vmem [shape: f32[1,128], index: 4, kind: input, shape index: {}]   ;;  %s1608_s5 = inlined_call_operand.hbm [shape: bf16[128,128], index: 5, kind: input, shape index: {}]   ;;  %s1609_s6 = inlined_call_operand.vmem [shape: f32[1,128], index: 6, kind: input, shape index: {}]   ;;  %s1610_s7 = inlined_call_operand.hbm [shape: f32[2,8], index: 7, kind: output, shape index: {}]  }
   0x1   :  { %13 = vsyncpa [#allocation6], 0 }
   0x2   :  { %14 = vsyncpa [#allocation9], 0 }
   0x3   :  { %15 = vsyncpa [#allocation4], 0 }
   0x4   :  { %20 = vsyncadd [#allocation3], 4064  ;;  %s1350_s24 = smov [#allocation5]  }
   0x5   :  { %s33_s25 = sshll.u32 %s1350_s24, 4  ;;  %s34_s25 = int_to_ptr.vmem [resolvable:$true] %s33_s25 }
   0x6   :  { %s1250_s26 = scalar_lea.vmem %s34_s25, 256  ;;  %p1255_p1 = scmp.lt.s32.totalorder %s34_s25, %s34_s25 }
   0x7   :  { %p1251_p0 = scmp.ne.s32.totalorder %s34_s25, %s1250_s26  ;;  %p1256_p2 = scmp.lt.s32.totalorder %s1250_s26, %s1250_s26 }
   0x9   :  { %p1257_p3 = por %p1256_p2, %p1255_p1 }
   0xb   :  { %p1258_p4 = pnand %p1257_p3, %p1251_p0 }
   0xd   :  { %1261 = shalt.err (!%p1258_p4)
}
   0xe   :  { %s1351_s27 = smov 64   ;;  %s1352_s28 = smov 4  }
   0xf   :  { %39 = dma.hbm_to_vmem [thread:$0]  %s1604_s1, 256, %s34_s25, [#allocation6], %s1351_s27, %s1351_s27, %s1352_s28  }
  0x10   :  { %s1353_s8 = smov [#allocation2]  }
  0x11   :  { %s21_s9 = sshll.u32 %s1353_s8, 4  ;;  %s22_s9 = int_to_ptr.vmem [resolvable:$true] %s21_s9 }
  0x12   :  { %s1270_s10 = scalar_lea.vmem %s22_s9, 32  ;;  %s1274_s11 = scalar_lea.vmem %s22_s9, 4096 }
  0x13   :  { %p1271_p5 = scmp.ne.s32.totalorder %s22_s9, %s1270_s10  ;;  %p1275_p6 = scmp.lt.s32.totalorder %s22_s9, %s22_s9 }
  0x14   :  { %p1276_p7 = scmp.lt.s32.totalorder %s1274_s11, %s1270_s10 }
  0x16   :  { %p1277_p8 = por %p1276_p7, %p1275_p6 }
  0x18   :  { %p1278_p9 = pnand %p1277_p8, %p1271_p5 }
  0x1a   :  { %1281 = shalt.err (!%p1278_p9)
}
  0x1b   :  { %s1354_s12 = smov 32   ;;  %s1355_s13 = smov 2  }
  0x1c   :  { %27 = dma.hbm_to_vmem [thread:$0]  %s1603_s0, 32, %s22_s9, [#allocation3], %s1354_s12, %s1354_s12, %s1355_s13  }
  0x1d   :  { %s1356_s1 = smov [#allocation7]   ;;  %s1357_s17 = smov [#allocation8]  }
  0x1e   :  { %s47_s16 = sshll.u32 %s1356_s1, 4  ;;  %s61_s18 = sshll.u32 %s1357_s17, 4  ;;  %s48_s16 = int_to_ptr.vmem [resolvable:$true] %s47_s16  ;;  %s62_s18 = int_to_ptr.vmem [resolvable:$true] %s61_s18 }
  0x1f   :  { %s1290_s19 = scalar_lea.vmem %s48_s16, 1024  ;;  %p1295_p11 = scmp.lt.s32.totalorder %s48_s16, %s48_s16 }
  0x20   :  { %p1291_p10 = scmp.ne.s32.totalorder %s48_s16, %s1290_s19  ;;  %p1296_p12 = scmp.lt.s32.totalorder %s1290_s19, %s1290_s19 }
  0x22   :  { %p1297_p13 = por %p1296_p12, %p1295_p11 }
  0x24   :  { %p1298_p0 = pnand %p1297_p13, %p1291_p10 }
  0x26   :  { %1301 = shalt.err (!%p1298_p0)
}
  0x27   :  { %53 = dma.hbm_to_vmem [thread:$0]  %s1606_s3, 1024, %s48_s16, [#allocation6], %s1351_s27, %s1351_s27, %s1352_s28  }
  0x28   :  { %s1310_s0 = scalar_lea.vmem %s62_s18, 1024  ;;  %p1315_p2 = scmp.lt.s32.totalorder %s62_s18, %s62_s18 }
  0x29   :  { %p1311_p1 = scmp.ne.s32.totalorder %s62_s18, %s1310_s0  ;;  %p1316_p3 = scmp.lt.s32.totalorder %s1310_s0, %s1310_s0 }
  0x2b   :  { %p1317_p4 = por %p1316_p3, %p1315_p2 }
  0x2d   :  { %p1318_p5 = pnand %p1317_p4, %p1311_p1 }
  0x2f   :  { %1321 = shalt.err (!%p1318_p5)
}
  0x30   :  { %67 = dma.hbm_to_vmem [thread:$0]  %s1608_s5, 1024, %s62_s18, [#allocation9], %s1351_s27, %s1351_s27, %s1352_s28  }
  0x31   :  { %1342 = dma.done.wait [#allocation3], 4096  }
  0x32   :  { %1343 = vsyncadd [#allocation3], 4294963200 }
  0x33   :  { %1344 = dma.done.wait [#allocation6], 1280  }
  0x34   :  { %1345 = vsyncadd [#allocation6], 4294966016 }
  0x35   :  { %1346 = dma.done.wait [#allocation9], 1024  }
  0x36   :  { %1347 = vsyncadd [#allocation9], 4294966272  ;;  %v1224_v0 = vld [vmem:[#allocation5 + $0x8] sm:$0xff]   ;;  %v1225_v1 = vld [vmem:[#allocation5] sm:$0xff]   ;;  %vm154_vm0 = vcmask 261120   ;;  %vm924_vm1 = vcmask 64512  }
  0x37   :  { %1079 = vmatprep.subr.bf16.mxu0 %v1224_v0  ;;  %v83_v2 = vld [vmem:[#allocation2] sm:$0xff]  ;;  %v84_v3 = vld [vmem:[#allocation2 + $0x8] sm:$0xff]  ;;  %1211 = vmatprep.subr.bf16.mxu1 %v1224_v0  ;;  %v85_v5 = vld [vmem:[#allocation2 + $0x10] sm:$0xff] }
  0x38   :  { %1080 = vmatpush3.bf16.msra.mxu0 %v1224_v0  ;;  %v115_v4 = vpack.c.bf16 %v84_v3, %v83_v2  ;;  %v86_v6 = vld [vmem:[#allocation2 + $0x18] sm:$0xff]  ;;  %1213 = vmatpush3.bf16.msra.mxu1 %v1224_v0  ;;  %v87_v7 = vld [vmem:[#allocation2 + $0x20] sm:$0xff]  ;;  %v88_v8 = vld [vmem:[#allocation2 + $0x28] sm:$0xff] }
  0x39   :  { %1081 = vmatprep.subr.bf16.mxu0 %v1225_v1  ;;  %1212 = vmatprep.subr.bf16.mxu1 %v1225_v1  ;;  %v116_v9 = vpack.c.bf16 %v86_v6, %v85_v5  ;;  %v117_v10 = vpack.c.bf16 %v88_v8, %v87_v7  ;;  %v99_v11 = vld [vmem:[#allocation2 + $0x80] sm:$0xff]  ;;  %v100_v12 = vld [vmem:[#allocation2 + $0x88] sm:$0xff]  ;;  %v101_v14 = vld [vmem:[#allocation2 + $0x90] sm:$0xff] }
  0x3a   :  { %1083 = vmatprep.mubr.msk.bf16.mxu0 %vm154_vm0, %v115_v4  ;;  %v123_v13 = vpack.c.bf16 %v100_v12, %v99_v11  ;;  %v102_v15 = vld [vmem:[#allocation2 + $0x98] sm:$0xff]  ;;  %v103_v16 = vld [vmem:[#allocation2 + $0xa0] sm:$0xff]  ;;  %v104_v18 = vld [vmem:[#allocation2 + $0xa8] sm:$0xff] }
  0x3b   :  { %v124_v17 = vpack.c.bf16 %v102_v15, %v101_v14  ;;  %v89_v19 = vld [vmem:[#allocation2 + $0x30] sm:$0xff]  ;;  %v90_v20 = vld [vmem:[#allocation2 + $0x38] sm:$0xff]  ;;  %v91_v21 = vld [vmem:[#allocation2 + $0x40] sm:$0xff]  ;;  %v125_v22 = vpack.c.bf16 %v104_v18, %v103_v16 }
  0x3c   :  { %1082 = vmatpush3.bf16.msra.mxu0 %v1225_v1  ;;  %1214 = vmatpush3.bf16.msra.mxu1 %v1225_v1  ;;  %v92_v23 = vld [vmem:[#allocation2 + $0x48] sm:$0xff]  ;;  %v105_v24 = vld [vmem:[#allocation2 + $0xb0] sm:$0xff]  ;;  %v106_v25 = vld [vmem:[#allocation2 + $0xb8] sm:$0xff]  ;;  %v118_v29 = vpack.c.bf16 %v90_v20, %v89_v19 }
  0x3d   :  { %1099 = vmatprep.mubr.msk.bf16.mxu1 %vm154_vm0, %v123_v13  ;;  %v107_v26 = vld [vmem:[#allocation2 + $0xc0] sm:$0xff]  ;;  %v108_v27 = vld [vmem:[#allocation2 + $0xc8] sm:$0xff]  ;;  %v119_v31 = vpack.c.bf16 %v92_v23, %v91_v21  ;;  %v126_v32 = vpack.c.bf16 %v106_v25, %v105_v24  ;;  %v93_v34 = vld [vmem:[#allocation2 + $0x50] sm:$0xff] }
  0x3e   :  { %v1226_v28 = vld [vmem:[#allocation7 + $0x38] sm:$0xff]   ;;  %v1227_v30 = vld [vmem:[#allocation7 + $0x30] sm:$0xff]   ;;  %v127_v33 = vpack.c.bf16 %v108_v27, %v107_v26  ;;  %v94_v35 = vld [vmem:[#allocation2 + $0x58] sm:$0xff] }
  0x3f   :  { %1084 = vmatmul.mubr.msk.bf16.vlgmr.msra.gmra.mxu0 %vm154_vm0, %v116_v9  ;;  %1100 = vmatmul.mubr.msk.bf16.vlgmr.msra.gmra.mxu1 %vm154_vm0, %v124_v17  ;;  %v1228_v36 = vld [vmem:[#allocation7 + $0x28] sm:$0xff]   ;;  %v95_v37 = vld [vmem:[#allocation2 + $0x60] sm:$0xff]  ;;  %v96_v38 = vld [vmem:[#allocation2 + $0x68] sm:$0xff]  ;;  %v120_v44 = vpack.c.bf16 %v94_v35, %v93_v34 }
  0x40   :  { %1087 = vmatprep.mubr.msk.bf16.mxu0 %vm154_vm0, %v117_v10  ;;  %1103 = vmatprep.mubr.msk.bf16.mxu1 %vm154_vm0, %v125_v22  ;;  %v109_v39 = vld [vmem:[#allocation2 + $0xd0] sm:$0xff]  ;;  %v110_v40 = vld [vmem:[#allocation2 + $0xd8] sm:$0xff]  ;;  %v111_v41 = vld [vmem:[#allocation2 + $0xe0] sm:$0xff]  ;;  %v121_v45 = vpack.c.bf16 %v96_v38, %v95_v37 }
  0x41   :  { %1115 = vmatprep.subr.bf16.mxu1 %v1226_v28  ;;  %v112_v42 = vld [vmem:[#allocation2 + $0xe8] sm:$0xff]  ;;  %v1229_v43 = vld [vmem:[#allocation7 + $0x20] sm:$0xff]   ;;  %v128_v46 = vpack.c.bf16 %v110_v40, %v109_v39  ;;  %v98_v50 = vld [vmem:[#allocation2 + $0x78] sm:$0xff] }
  0x42   :  { %1116 = vmatpush3.bf16.msra.mxu1 %v1226_v28  ;;  %v129_v47 = vpack.c.bf16 %v112_v42, %v111_v41  ;;  %v1230_v48 = vld [vmem:[#allocation7 + $0x18] sm:$0xff]   ;;  %v97_v49 = vld [vmem:[#allocation2 + $0x70] sm:$0xff]  ;;  %v114_v52 = vld [vmem:[#allocation2 + $0xf8] sm:$0xff] }
  0x43   :  { %1117 = vmatprep.subr.bf16.mxu1 %v1227_v30  ;;  %v113_v51 = vld [vmem:[#allocation2 + $0xf0] sm:$0xff]  ;;  %v122_v53 = vpack.c.bf16 %v98_v50, %v97_v49  ;;  %v1231_v55 = vld [vmem:[#allocation7 + $0x10] sm:$0xff]   ;;  %v1232_v56 = vld [vmem:[#allocation7 + $0x8] sm:$0xff]  }
  0x44   :  { %v130_v54 = vpack.c.bf16 %v114_v52, %v113_v51  ;;  %v1233_v57 = vld [vmem:[#allocation7] sm:$0xff]   ;;  %v1234_v58 = vld [vmem:[#allocation8 + $0x38] sm:$0xff]   ;;  %v1235_v59 = vld [vmem:[#allocation8 + $0x30] sm:$0xff]  }
  0x45   :  { %1163 = vmatprep.subr.bf16.mxu0 %v1234_v58  ;;  %v1236_v60 = vld [vmem:[#allocation8 + $0x28] sm:$0xff]   ;;  %v1237_v61 = vld [vmem:[#allocation8 + $0x20] sm:$0xff]   ;;  %v1238_v62 = vld [vmem:[#allocation8 + $0x18] sm:$0xff]  }
  0x46   :  { %1118 = vmatpush3.bf16.msra.mxu1 %v1227_v30  ;;  %1164 = vmatpush3.bf16.msra.mxu0 %v1234_v58  ;;  %v1444_v2 = vld [vmem:[%s1605_s2] ss:$0 sm:$0xff] }
  0x47   :  { %1088 = vmatmul.mubr.msk.bf16.gmra.mxu0 %vm154_vm0, %v118_v29  ;;  %1104 = vmatmul.mubr.msk.bf16.gmra.mxu1 %vm154_vm0, %v126_v32 }
  0x48   :  { %1091 = vmatprep.mubr.msk.bf16.mxu0 %vm154_vm0, %v119_v31  ;;  %1107 = vmatprep.mubr.msk.bf16.mxu1 %vm154_vm0, %v127_v33 }
  0x49   :  { %1119 = vmatprep.subr.bf16.mxu1 %v1228_v36  ;;  %1165 = vmatprep.subr.bf16.mxu0 %v1235_v59 }
  0x4a   :  { %1120 = vmatpush3.bf16.msra.mxu1 %v1228_v36  ;;  %1166 = vmatpush3.bf16.msra.mxu0 %v1235_v59 }
  0x4b   :  { %1121 = vmatprep.subr.bf16.mxu1 %v1229_v43  ;;  %1167 = vmatprep.subr.bf16.mxu0 %v1236_v60 }
  0x4e   :  { %1122 = vmatpush3.bf16.msra.mxu1 %v1229_v43  ;;  %1168 = vmatpush3.bf16.msra.mxu0 %v1236_v60 }
  0x4f   :  { %1092 = vmatmul.mubr.msk.bf16.gmra.mxu0 %vm154_vm0, %v120_v44  ;;  %1108 = vmatmul.mubr.msk.bf16.gmra.mxu1 %vm154_vm0, %v128_v46 }
  0x50   :  { %1095 = vmatprep.mubr.msk.bf16.mxu0 %vm154_vm0, %v121_v45  ;;  %1111 = vmatprep.mubr.msk.bf16.mxu1 %vm154_vm0, %v129_v47 }
  0x51   :  { %1123 = vmatprep.subr.bf16.mxu1 %v1230_v48  ;;  %1169 = vmatprep.subr.bf16.mxu0 %v1237_v61 }
  0x52   :  { %1124 = vmatpush3.bf16.msra.mxu1 %v1230_v48  ;;  %1170 = vmatpush3.bf16.msra.mxu0 %v1237_v61 }
  0x53   :  { %1125 = vmatprep.subr.bf16.mxu1 %v1231_v55  ;;  %1171 = vmatprep.subr.bf16.mxu0 %v1238_v62 }
  0x56   :  { %1126 = vmatpush3.bf16.msra.mxu1 %v1231_v55  ;;  %1172 = vmatpush3.bf16.msra.mxu0 %v1238_v62 }
  0x57   :  { %1096 = vmatmul.mubr.msk.bf16.gmra.mxu0 %vm154_vm0, %v122_v53  ;;  %1112 = vmatmul.mubr.msk.bf16.gmra.mxu1 %vm154_vm0, %v130_v54 }
  0x58   :  { %1127 = vmatprep.subr.bf16.mxu1 %v1232_v56 }
  0x5a   :  { %1128 = vmatpush3.bf16.msra.mxu1 %v1232_v56 }
  0x5b   :  { %1129 = vmatprep.subr.bf16.mxu1 %v1233_v57 }
  0x5e   :  { %1130 = vmatpush3.bf16.msra.mxu1 %v1233_v57 }
  0xff   :  { %v1085_v63 = vpop.f32.mrf.mxu0  ;;  %v1439_v0 = vpop.f32.mrf.mxu1 }
 0x100   :  { %v246_v8 = vadd.f32 %v1085_v63, %v1444_v2 }
 0x101   :  { %v237_v1 = vpop.f32.mrf.mxu0  ;;  %v301_v3 = vpop.f32.mrf.mxu1 }
 0x102   :  { %v238_v5 = vadd.f32 %v1444_v2, %v237_v1  ;;  %v366_v17 = vmax.f32 %v246_v8, 0.0  ;;  %v302_v53 = vadd.f32 %v1444_v2, %v301_v3 }
 0x103   :  { %v1086_v4 = vpop.f32.mrf.mxu0  ;;  %v1448_v7 = vpop.f32.mrf.mxu1 }
 0x104   :  { %v249_v6 = vadd.f32 %v1086_v4, %v1444_v2  ;;  %v364_v14 = vmax.f32 %v238_v5, 0.0  ;;  %v380_v62 = vmax.f32 %v302_v53, 0.0 }
 0x105   :  { %v240_v9 = vpop.f32.mrf.mxu0  ;;  %v304_v11 = vpop.f32.mrf.mxu1 }
 0x106   :  { %v241_v10 = vadd.f32 %v1444_v2, %v240_v9  ;;  %v367_v12 = vmax.f32 %v249_v6, 0.0  ;;  %v305_v54 = vadd.f32 %v1444_v2, %v304_v11 }
 0x107   :  { %v1089_v13 = vpop.f32.mrf.mxu0  ;;  %v1452_v16 = vpop.f32.mrf.mxu1 }
 0x108   :  { %v365_v15 = vmax.f32 %v241_v10, 0.0  ;;  %v397_v21 = vpack.c.bf16 %v367_v12, %v366_v17  ;;  %v262_v26 = vadd.f32 %v1089_v13, %v1444_v2  ;;  %v381_v1 = vmax.f32 %v305_v54, 0.0 }
 0x109   :  { %v253_v18 = vpop.f32.mrf.mxu0  ;;  %v317_v20 = vpop.f32.mrf.mxu1  ;;  %v310_v13 = vadd.f32 %v1439_v0, %v1444_v2  ;;  %v326_v0 = vadd.f32 %v1452_v16, %v1444_v2 }
 0x10a   :  { %v396_v19 = vpack.c.bf16 %v365_v15, %v364_v14  ;;  %v254_v23 = vadd.f32 %v1444_v2, %v253_v18  ;;  %v370_v34 = vmax.f32 %v262_v26, 0.0  ;;  %v404_v10 = vpack.c.bf16 %v381_v1, %v380_v62 }
 0x10b   :  { %v1090_v22 = vpop.f32.mrf.mxu0  ;;  %v1456_v25 = vpop.f32.mrf.mxu1  ;;  %v318_v11 = vadd.f32 %v1444_v2, %v317_v20  ;;  %v313_v15 = vadd.f32 %v1448_v7, %v1444_v2 }
 0x10c   :  { %v265_v24 = vadd.f32 %v1090_v22, %v1444_v2  ;;  %1131 = vmatprep.mubr.bf16.mxu1 %v396_v19  ;;  %v368_v32 = vmax.f32 %v254_v23, 0.0  ;;  %v329_v7 = vadd.f32 %v1456_v25, %v1444_v2 }
 0x10d   :  { %v256_v27 = vpop.f32.mrf.mxu0  ;;  %1132 = vmatmul.mubr.bf16.vlgmr.msra.gmra.mxu1 %v397_v21  ;;  %v320_v31 = vpop.f32.mrf.mxu1  ;;  %v384_v18 = vmax.f32 %v318_v11, 0.0  ;;  %v382_v21 = vmax.f32 %v310_v13, 0.0  ;;  %v383_v22 = vmax.f32 %v313_v15, 0.0 }
 0x10e   :  { %v257_v28 = vadd.f32 %v1444_v2, %v256_v27  ;;  %v371_v29 = vmax.f32 %v265_v24, 0.0  ;;  %v321_v12 = vadd.f32 %v1444_v2, %v320_v31  ;;  %v386_v31 = vmax.f32 %v326_v0, 0.0 }
 0x10f   :  { %v1093_v30 = vpop.f32.mrf.mxu0  ;;  %v1460_v39 = vpop.f32.mrf.mxu1  ;;  %v405_v27 = vpack.c.bf16 %v383_v22, %v382_v21 }
 0x110   :  { %v369_v33 = vmax.f32 %v257_v28, 0.0  ;;  %v399_v37 = vpack.c.bf16 %v371_v29, %v370_v34  ;;  %v278_v42 = vadd.f32 %v1093_v30, %v1444_v2  ;;  %v385_v19 = vmax.f32 %v321_v12, 0.0 }
 0x111   :  { %v269_v35 = vpop.f32.mrf.mxu0  ;;  %v333_v47 = vpop.f32.mrf.mxu1  ;;  %v342_v16 = vadd.f32 %v1460_v39, %v1444_v2  ;;  %v1239_v39 = vld [vmem:[#allocation8 + $0x10] sm:$0xff]  }
 0x112   :  { %v398_v36 = vpack.c.bf16 %v369_v33, %v368_v32  ;;  %v270_v40 = vadd.f32 %v1444_v2, %v269_v35  ;;  %v374_v50 = vmax.f32 %v278_v42, 0.0  ;;  %v406_v24 = vpack.c.bf16 %v385_v19, %v384_v18  ;;  %1173 = vmatprep.subr.bf16.mxu0 %v1239_v39 }
 0x113   :  { %v1094_v38 = vpop.f32.mrf.mxu0  ;;  %v1110_v57 = vpop.f32.mrf.mxu1  ;;  %v334_v20 = vadd.f32 %v1444_v2, %v333_v47  ;;  %v387_v32 = vmax.f32 %v329_v7, 0.0  ;;  %1174 = vmatpush3.bf16.msra.mxu0 %v1239_v39 }
 0x114   :  { %v281_v41 = vadd.f32 %v1094_v38, %v1444_v2  ;;  %1135 = vmatprep.mubr.bf16.mxu1 %v398_v36  ;;  %v372_v48 = vmax.f32 %v270_v40, 0.0  ;;  %v345_v38 = vadd.f32 %v1110_v57, %v1444_v2 }
 0x115   :  { %v272_v43 = vpop.f32.mrf.mxu0  ;;  %1136 = vmatmul.mubr.bf16.gmra.mxu1 %v399_v37  ;;  %v336_v3 = vpop.f32.mrf.mxu1  ;;  %v388_v29 = vmax.f32 %v334_v20, 0.0  ;;  %v407_v37 = vpack.c.bf16 %v387_v32, %v386_v31 }
 0x116   :  { %v273_v44 = vadd.f32 %v1444_v2, %v272_v43  ;;  %v375_v45 = vmax.f32 %v281_v41, 0.0  ;;  %v337_v26 = vadd.f32 %v1444_v2, %v336_v3  ;;  %v390_v41 = vmax.f32 %v342_v16, 0.0 }
 0x117   :  { %v1097_v46 = vpop.f32.mrf.mxu0  ;;  %v1113_v17 = vpop.f32.mrf.mxu1  ;;  %v391_v42 = vmax.f32 %v345_v38, 0.0 }
 0x118   :  { %v373_v49 = vmax.f32 %v273_v44, 0.0  ;;  %v401_v55 = vpack.c.bf16 %v375_v45, %v374_v50  ;;  %v294_v60 = vadd.f32 %v1097_v46, %v1444_v2  ;;  %v389_v30 = vmax.f32 %v337_v26, 0.0  ;;  %v1240_v50 = vld [vmem:[#allocation8 + $0x8] sm:$0xff]  }
 0x119   :  { %v285_v51 = vpop.f32.mrf.mxu0  ;;  %v349_v23 = vpop.f32.mrf.mxu1  ;;  %v409_v44 = vpack.c.bf16 %v391_v42, %v390_v41  ;;  %v358_v45 = vadd.f32 %v1113_v17, %v1444_v2  ;;  %1175 = vmatprep.subr.bf16.mxu0 %v1240_v50 }
 0x11a   :  { %v400_v52 = vpack.c.bf16 %v373_v49, %v372_v48  ;;  %v286_v58 = vadd.f32 %v1444_v2, %v285_v51  ;;  %v378_v8 = vmax.f32 %v294_v60, 0.0  ;;  %v408_v34 = vpack.c.bf16 %v389_v30, %v388_v29  ;;  %1176 = vmatpush3.bf16.msra.mxu0 %v1240_v50  ;;  %v1241_v51 = vld [vmem:[#allocation8] sm:$0xff]  }
 0x11b   :  { %v1098_v56 = vpop.f32.mrf.mxu0  ;;  %v1114_v28 = vpop.f32.mrf.mxu1  ;;  %v350_v35 = vadd.f32 %v1444_v2, %v349_v23  ;;  %v394_v47 = vmax.f32 %v358_v45, 0.0  ;;  %1177 = vmatprep.subr.bf16.mxu0 %v1241_v51 }
 0x11c   :  { %v297_v59 = vadd.f32 %v1098_v56, %v1444_v2  ;;  %1139 = vmatprep.mubr.bf16.mxu1 %v400_v52  ;;  %v376_v5 = vmax.f32 %v286_v58, 0.0  ;;  %v361_v46 = vadd.f32 %v1114_v28, %v1444_v2 }
 0x11d   :  { %v288_v61 = vpop.f32.mrf.mxu0  ;;  %1140 = vmatmul.mubr.bf16.gmra.mxu1 %v401_v55  ;;  %v352_v33 = vpop.f32.mrf.mxu1  ;;  %v392_v25 = vmax.f32 %v350_v35, 0.0 }
 0x11e   :  { %v289_v63 = vadd.f32 %v1444_v2, %v288_v61  ;;  %v379_v4 = vmax.f32 %v297_v59, 0.0  ;;  %v353_v36 = vadd.f32 %v1444_v2, %v352_v33  ;;  %v395_v48 = vmax.f32 %v361_v46, 0.0  ;;  %1178 = vmatpush3.bf16.msra.mxu0 %v1241_v51  ;;  %v1494_v2 = vld [vmem:[%s1607_s4] ss:$0 sm:$0xff] }
 0x120   :  { %v377_v6 = vmax.f32 %v289_v63, 0.0  ;;  %v403_v14 = vpack.c.bf16 %v379_v4, %v378_v8  ;;  %v393_v40 = vmax.f32 %v353_v36, 0.0  ;;  %v411_v49 = vpack.c.bf16 %v395_v48, %v394_v47 }
 0x122   :  { %v402_v9 = vpack.c.bf16 %v377_v6, %v376_v5  ;;  %v410_v43 = vpack.c.bf16 %v393_v40, %v392_v25 }
 0x124   :  { %1143 = vmatprep.mubr.bf16.mxu1 %v402_v9 }
 0x125   :  { %1144 = vmatmul.mubr.bf16.gmra.mxu1 %v403_v14 }
 0x126   :  { %1147 = vmatprep.mubr.bf16.mxu1 %v404_v10 }
 0x12d   :  { %1148 = vmatmul.mubr.bf16.gmra.mxu1 %v405_v27 }
 0x12e   :  { %1151 = vmatprep.mubr.bf16.mxu1 %v406_v24 }
 0x135   :  { %1152 = vmatmul.mubr.bf16.gmra.mxu1 %v407_v37 }
 0x136   :  { %1155 = vmatprep.mubr.bf16.mxu1 %v408_v34 }
 0x13d   :  { %1156 = vmatmul.mubr.bf16.gmra.mxu1 %v409_v44 }
 0x13e   :  { %1159 = vmatprep.mubr.bf16.mxu1 %v410_v43 }
 0x145   :  { %1160 = vmatmul.mubr.bf16.gmra.mxu1 %v411_v49 }
 0x1cd   :  { %v1133_v52 = vpop.f32.mrf.mxu1 }
 0x1ce   :  { %v526_v57 = vadd.f32 %v1133_v52, %v1494_v2 }
 0x1cf   :  { %v517_v53 = vpop.f32.mrf.mxu1 }
 0x1d0   :  { %v518_v55 = vadd.f32 %v1494_v2, %v517_v53  ;;  %v646_v1 = vmax.f32 %v526_v57, 0.0 }
 0x1d1   :  { %v1134_v54 = vpop.f32.mrf.mxu1 }
 0x1d2   :  { %v529_v56 = vadd.f32 %v1134_v54, %v1494_v2  ;;  %v644_v62 = vmax.f32 %v518_v55, 0.0 }
 0x1d3   :  { %v520_v58 = vpop.f32.mrf.mxu1 }
 0x1d4   :  { %v521_v59 = vadd.f32 %v1494_v2, %v520_v58  ;;  %v647_v60 = vmax.f32 %v529_v56, 0.0 }
 0x1d5   :  { %v1137_v61 = vpop.f32.mrf.mxu1 }
 0x1d6   :  { %v645_v63 = vmax.f32 %v521_v59, 0.0  ;;  %v677_v5 = vpack.c.bf16 %v647_v60, %v646_v1  ;;  %v542_v10 = vadd.f32 %v1137_v61, %v1494_v2 }
 0x1d7   :  { %v533_v4 = vpop.f32.mrf.mxu1 }
 0x1d8   :  { %v676_v3 = vpack.c.bf16 %v645_v63, %v644_v62  ;;  %v534_v8 = vadd.f32 %v1494_v2, %v533_v4  ;;  %v650_v18 = vmax.f32 %v542_v10, 0.0 }
 0x1d9   :  { %v1138_v6 = vpop.f32.mrf.mxu1 }
 0x1da   :  { %v545_v9 = vadd.f32 %v1138_v6, %v1494_v2  ;;  %1179 = vmatprep.mubr.bf16.mxu0 %v676_v3  ;;  %v648_v15 = vmax.f32 %v534_v8, 0.0 }
 0x1db   :  { %v536_v11 = vpop.f32.mrf.mxu1  ;;  %1180 = vmatmul.mubr.bf16.vlgmr.msra.gmra.mxu0 %v677_v5 }
 0x1dc   :  { %v537_v12 = vadd.f32 %v1494_v2, %v536_v11  ;;  %v651_v13 = vmax.f32 %v545_v9, 0.0 }
 0x1dd   :  { %v1141_v14 = vpop.f32.mrf.mxu1 }
 0x1de   :  { %v649_v17 = vmax.f32 %v537_v12, 0.0  ;;  %v679_v22 = vpack.c.bf16 %v651_v13, %v650_v18  ;;  %v558_v26 = vadd.f32 %v1141_v14, %v1494_v2 }
 0x1df   :  { %v549_v19 = vpop.f32.mrf.mxu1 }
 0x1e0   :  { %v678_v21 = vpack.c.bf16 %v649_v17, %v648_v15  ;;  %v550_v24 = vadd.f32 %v1494_v2, %v549_v19  ;;  %v654_v31 = vmax.f32 %v558_v26, 0.0 }
 0x1e1   :  { %v1142_v23 = vpop.f32.mrf.mxu1 }
 0x1e2   :  { %v561_v20 = vadd.f32 %v1142_v23, %v1494_v2  ;;  %1183 = vmatprep.mubr.bf16.mxu0 %v678_v21  ;;  %v652_v29 = vmax.f32 %v550_v24, 0.0 }
 0x1e3   :  { %v552_v27 = vpop.f32.mrf.mxu1  ;;  %1184 = vmatmul.mubr.bf16.gmra.mxu0 %v679_v22 }
 0x1e4   :  { %v553_v0 = vadd.f32 %v1494_v2, %v552_v27  ;;  %v655_v7 = vmax.f32 %v561_v20, 0.0 }
 0x1e5   :  { %v1145_v28 = vpop.f32.mrf.mxu1 }
 0x1e6   :  { %v653_v30 = vmax.f32 %v553_v0, 0.0  ;;  %v681_v34 = vpack.c.bf16 %v655_v7, %v654_v31  ;;  %v574_v16 = vadd.f32 %v1145_v28, %v1494_v2 }
 0x1e7   :  { %v565_v32 = vpop.f32.mrf.mxu1 }
 0x1e8   :  { %v680_v33 = vpack.c.bf16 %v653_v30, %v652_v29  ;;  %v566_v36 = vadd.f32 %v1494_v2, %v565_v32  ;;  %v658_v44 = vmax.f32 %v574_v16, 0.0 }
 0x1e9   :  { %v1146_v35 = vpop.f32.mrf.mxu1 }
 0x1ea   :  { %v577_v37 = vadd.f32 %v1146_v35, %v1494_v2  ;;  %1187 = vmatprep.mubr.bf16.mxu0 %v680_v33  ;;  %v656_v42 = vmax.f32 %v566_v36, 0.0 }
 0x1eb   :  { %v568_v38 = vpop.f32.mrf.mxu1  ;;  %1188 = vmatmul.mubr.bf16.gmra.mxu0 %v681_v34 }
 0x1ec   :  { %v569_v25 = vadd.f32 %v1494_v2, %v568_v38  ;;  %v659_v40 = vmax.f32 %v577_v37, 0.0 }
 0x1ed   :  { %v1149_v41 = vpop.f32.mrf.mxu1 }
 0x1ee   :  { %v657_v43 = vmax.f32 %v569_v25, 0.0  ;;  %v683_v47 = vpack.c.bf16 %v659_v40, %v658_v44  ;;  %v590_v50 = vadd.f32 %v1149_v41, %v1494_v2  ;;  %v1531_v25 = vld [vmem:[%s1609_s6] ss:$0 sm:$0xff] }
 0x1ef   :  { %v581_v45 = vpop.f32.mrf.mxu1 }
 0x1f0   :  { %v682_v46 = vpack.c.bf16 %v657_v43, %v656_v42  ;;  %v582_v49 = vadd.f32 %v1494_v2, %v581_v45  ;;  %v662_v57 = vmax.f32 %v590_v50, 0.0 }
 0x1f1   :  { %v1150_v48 = vpop.f32.mrf.mxu1 }
 0x1f2   :  { %v593_v39 = vadd.f32 %v1150_v48, %v1494_v2  ;;  %1191 = vmatprep.mubr.bf16.mxu0 %v682_v46  ;;  %v660_v55 = vmax.f32 %v582_v49, 0.0 }
 0x1f3   :  { %v584_v51 = vpop.f32.mrf.mxu1  ;;  %1192 = vmatmul.mubr.bf16.gmra.mxu0 %v683_v47 }
 0x1f4   :  { %v585_v52 = vadd.f32 %v1494_v2, %v584_v51  ;;  %v663_v53 = vmax.f32 %v593_v39, 0.0 }
 0x1f5   :  { %v1153_v54 = vpop.f32.mrf.mxu1 }
 0x1f6   :  { %v661_v56 = vmax.f32 %v585_v52, 0.0  ;;  %v685_v60 = vpack.c.bf16 %v663_v53, %v662_v57  ;;  %v606_v1 = vadd.f32 %v1153_v54, %v1494_v2 }
 0x1f7   :  { %v597_v58 = vpop.f32.mrf.mxu1 }
 0x1f8   :  { %v684_v59 = vpack.c.bf16 %v661_v56, %v660_v55  ;;  %v598_v62 = vadd.f32 %v1494_v2, %v597_v58  ;;  %v666_v10 = vmax.f32 %v606_v1, 0.0 }
 0x1f9   :  { %v1154_v61 = vpop.f32.mrf.mxu1 }
 0x1fa   :  { %v609_v63 = vadd.f32 %v1154_v61, %v1494_v2  ;;  %1195 = vmatprep.mubr.bf16.mxu0 %v684_v59  ;;  %v664_v8 = vmax.f32 %v598_v62, 0.0 }
 0x1fb   :  { %v600_v4 = vpop.f32.mrf.mxu1  ;;  %1196 = vmatmul.mubr.bf16.gmra.mxu0 %v685_v60 }
 0x1fc   :  { %v601_v3 = vadd.f32 %v1494_v2, %v600_v4  ;;  %v667_v5 = vmax.f32 %v609_v63, 0.0 }
 0x1fd   :  { %v1157_v6 = vpop.f32.mrf.mxu1 }
 0x1fe   :  { %v665_v9 = vmax.f32 %v601_v3, 0.0  ;;  %v687_v13 = vpack.c.bf16 %v667_v5, %v666_v10  ;;  %v622_v18 = vadd.f32 %v1157_v6, %v1494_v2 }
 0x1ff   :  { %v613_v11 = vpop.f32.mrf.mxu1 }
 0x200   :  { %v686_v12 = vpack.c.bf16 %v665_v9, %v664_v8  ;;  %v614_v15 = vadd.f32 %v1494_v2, %v613_v11  ;;  %v670_v26 = vmax.f32 %v622_v18, 0.0 }
 0x201   :  { %v1158_v14 = vpop.f32.mrf.mxu1 }
 0x202   :  { %v625_v17 = vadd.f32 %v1158_v14, %v1494_v2  ;;  %1199 = vmatprep.mubr.bf16.mxu0 %v686_v12  ;;  %v668_v24 = vmax.f32 %v614_v15, 0.0 }
 0x203   :  { %v616_v19 = vpop.f32.mrf.mxu1  ;;  %1200 = vmatmul.mubr.bf16.gmra.mxu0 %v687_v13 }
 0x204   :  { %v617_v21 = vadd.f32 %v1494_v2, %v616_v19  ;;  %v671_v22 = vmax.f32 %v625_v17, 0.0 }
 0x205   :  { %v1161_v23 = vpop.f32.mrf.mxu1 }
 0x206   :  { %v669_v20 = vmax.f32 %v617_v21, 0.0  ;;  %v689_v7 = vpack.c.bf16 %v671_v22, %v670_v26  ;;  %v638_v31 = vadd.f32 %v1161_v23, %v1494_v2 }
 0x207   :  { %v629_v27 = vpop.f32.mrf.mxu1 }
 0x208   :  { %v688_v0 = vpack.c.bf16 %v669_v20, %v668_v24  ;;  %v630_v29 = vadd.f32 %v1494_v2, %v629_v27  ;;  %v674_v37 = vmax.f32 %v638_v31, 0.0 }
 0x209   :  { %v1162_v28 = vpop.f32.mrf.mxu1 }
 0x20a   :  { %v641_v30 = vadd.f32 %v1162_v28, %v1494_v2  ;;  %1203 = vmatprep.mubr.bf16.mxu0 %v688_v0  ;;  %v672_v35 = vmax.f32 %v630_v29, 0.0 }
 0x20b   :  { %v632_v32 = vpop.f32.mrf.mxu1  ;;  %1204 = vmatmul.mubr.bf16.gmra.mxu0 %v689_v7 }
 0x20c   :  { %v633_v33 = vadd.f32 %v1494_v2, %v632_v32  ;;  %v675_v34 = vmax.f32 %v641_v30, 0.0 }
 0x20e   :  { %v673_v36 = vmax.f32 %v633_v33, 0.0  ;;  %v691_v38 = vpack.c.bf16 %v675_v34, %v674_v37 }
 0x210   :  { %v690_v16 = vpack.c.bf16 %v673_v36, %v672_v35 }
 0x212   :  { %1207 = vmatprep.mubr.bf16.mxu0 %v690_v16 }
 0x213   :  { %1208 = vmatmul.mubr.bf16.gmra.mxu0 %v691_v38 }
 0x29b   :  { %v1181_v40 = vpop.f32.mrf.mxu0 }
 0x29c   :  { %v806_v41 = vadd.f32 %v1181_v40, %v1531_v25 }
 0x29d   :  { %v797_v42 = vpop.f32.mrf.mxu0 }
 0x29e   :  { %927 = vst.msk [vmem:[#allocation10 + $0x10] sm:$0xff] %vm924_vm1, %v806_v41  ;;  %v798_v2 = vadd.f32 %v1531_v25, %v797_v42 }
 0x29f   :  { %v1182_v43 = vpop.f32.mrf.mxu0 }
 0x2a0   :  { %925 = vst.msk [vmem:[#allocation10] sm:$0xff] %vm924_vm1, %v798_v2  ;;  %v809_v44 = vadd.f32 %v1182_v43, %v1531_v25 }
 0x2a1   :  { %v800_v45 = vpop.f32.mrf.mxu0 }
 0x2a2   :  { %928 = vst.msk [vmem:[#allocation10 + $0x18] sm:$0xff] %vm924_vm1, %v809_v44  ;;  %v801_v46 = vadd.f32 %v1531_v25, %v800_v45 }
 0x2a3   :  { %v1185_v47 = vpop.f32.mrf.mxu0 }
 0x2a4   :  { %926 = vst.msk [vmem:[#allocation10 + $0x8] sm:$0xff] %vm924_vm1, %v801_v46  ;;  %v822_v48 = vadd.f32 %v1185_v47, %v1531_v25 }
 0x2a5   :  { %v813_v49 = vpop.f32.mrf.mxu0 }
 0x2a6   :  { %931 = vst.msk [vmem:[#allocation10 + $0x30] sm:$0xff] %vm924_vm1, %v822_v48  ;;  %v814_v39 = vadd.f32 %v1531_v25, %v813_v49 }
 0x2a7   :  { %v1186_v50 = vpop.f32.mrf.mxu0 }
 0x2a8   :  { %929 = vst.msk [vmem:[#allocation10 + $0x20] sm:$0xff] %vm924_vm1, %v814_v39  ;;  %v825_v51 = vadd.f32 %v1186_v50, %v1531_v25 }
 0x2a9   :  { %v816_v52 = vpop.f32.mrf.mxu0 }
 0x2aa   :  { %932 = vst.msk [vmem:[#allocation10 + $0x38] sm:$0xff] %vm924_vm1, %v825_v51  ;;  %v817_v53 = vadd.f32 %v1531_v25, %v816_v52 }
 0x2ab   :  { %v1189_v54 = vpop.f32.mrf.mxu0 }
 0x2ac   :  { %930 = vst.msk [vmem:[#allocation10 + $0x28] sm:$0xff] %vm924_vm1, %v817_v53  ;;  %v838_v55 = vadd.f32 %v1189_v54, %v1531_v25 }
 0x2ad   :  { %v829_v56 = vpop.f32.mrf.mxu0 }
 0x2ae   :  { %935 = vst.msk [vmem:[#allocation10 + $0x50] sm:$0xff] %vm924_vm1, %v838_v55  ;;  %v830_v57 = vadd.f32 %v1531_v25, %v829_v56 }
 0x2af   :  { %v1190_v58 = vpop.f32.mrf.mxu0 }
 0x2b0   :  { %933 = vst.msk [vmem:[#allocation10 + $0x40] sm:$0xff] %vm924_vm1, %v830_v57  ;;  %v841_v59 = vadd.f32 %v1190_v58, %v1531_v25 }
 0x2b1   :  { %v832_v60 = vpop.f32.mrf.mxu0 }
 0x2b2   :  { %936 = vst.msk [vmem:[#allocation10 + $0x58] sm:$0xff] %vm924_vm1, %v841_v59  ;;  %v833_v61 = vadd.f32 %v1531_v25, %v832_v60 }
 0x2b3   :  { %v1193_v62 = vpop.f32.mrf.mxu0 }
 0x2b4   :  { %934 = vst.msk [vmem:[#allocation10 + $0x48] sm:$0xff] %vm924_vm1, %v833_v61  ;;  %v854_v63 = vadd.f32 %v1193_v62, %v1531_v25 }
 0x2b5   :  { %v845_v1 = vpop.f32.mrf.mxu0 }
 0x2b6   :  { %939 = vst.msk [vmem:[#allocation10 + $0x70] sm:$0xff] %vm924_vm1, %v854_v63  ;;  %v846_v4 = vadd.f32 %v1531_v25, %v845_v1 }
 0x2b7   :  { %v1194_v3 = vpop.f32.mrf.mxu0 }
 0x2b8   :  { %937 = vst.msk [vmem:[#allocation10 + $0x60] sm:$0xff] %vm924_vm1, %v846_v4  ;;  %v857_v5 = vadd.f32 %v1194_v3, %v1531_v25 }
 0x2b9   :  { %v848_v6 = vpop.f32.mrf.mxu0 }
 0x2ba   :  { %940 = vst.msk [vmem:[#allocation10 + $0x78] sm:$0xff] %vm924_vm1, %v857_v5  ;;  %v849_v8 = vadd.f32 %v1531_v25, %v848_v6 }
 0x2bb   :  { %v1197_v9 = vpop.f32.mrf.mxu0 }
 0x2bc   :  { %938 = vst.msk [vmem:[#allocation10 + $0x68] sm:$0xff] %vm924_vm1, %v849_v8  ;;  %v870_v10 = vadd.f32 %v1197_v9, %v1531_v25 }
 0x2bd   :  { %v861_v11 = vpop.f32.mrf.mxu0 }
 0x2be   :  { %943 = vst.msk [vmem:[#allocation10 + $0x90] sm:$0xff] %vm924_vm1, %v870_v10  ;;  %v862_v12 = vadd.f32 %v1531_v25, %v861_v11 }
 0x2bf   :  { %v1198_v13 = vpop.f32.mrf.mxu0 }
 0x2c0   :  { %941 = vst.msk [vmem:[#allocation10 + $0x80] sm:$0xff] %vm924_vm1, %v862_v12  ;;  %v873_v14 = vadd.f32 %v1198_v13, %v1531_v25 }
 0x2c1   :  { %v864_v15 = vpop.f32.mrf.mxu0 }
 0x2c2   :  { %944 = vst.msk [vmem:[#allocation10 + $0x98] sm:$0xff] %vm924_vm1, %v873_v14  ;;  %v865_v17 = vadd.f32 %v1531_v25, %v864_v15 }
 0x2c3   :  { %v1201_v18 = vpop.f32.mrf.mxu0 }
 0x2c4   :  { %942 = vst.msk [vmem:[#allocation10 + $0x88] sm:$0xff] %vm924_vm1, %v865_v17  ;;  %v886_v19 = vadd.f32 %v1201_v18, %v1531_v25 }
 0x2c5   :  { %v877_v21 = vpop.f32.mrf.mxu0 }
 0x2c6   :  { %947 = vst.msk [vmem:[#allocation10 + $0xb0] sm:$0xff] %vm924_vm1, %v886_v19  ;;  %v878_v22 = vadd.f32 %v1531_v25, %v877_v21 }
 0x2c7   :  { %v1202_v23 = vpop.f32.mrf.mxu0 }
 0x2c8   :  { %945 = vst.msk [vmem:[#allocation10 + $0xa0] sm:$0xff] %vm924_vm1, %v878_v22  ;;  %v889_v24 = vadd.f32 %v1202_v23, %v1531_v25 }
 0x2c9   :  { %v880_v20 = vpop.f32.mrf.mxu0 }
 0x2ca   :  { %948 = vst.msk [vmem:[#allocation10 + $0xb8] sm:$0xff] %vm924_vm1, %v889_v24  ;;  %v881_v26 = vadd.f32 %v1531_v25, %v880_v20 }
 0x2cb   :  { %v1205_v27 = vpop.f32.mrf.mxu0 }
 0x2cc   :  { %946 = vst.msk [vmem:[#allocation10 + $0xa8] sm:$0xff] %vm924_vm1, %v881_v26  ;;  %v902_v0 = vadd.f32 %v1205_v27, %v1531_v25 }
 0x2cd   :  { %v893_v7 = vpop.f32.mrf.mxu0 }
 0x2ce   :  { %951 = vst.msk [vmem:[#allocation10 + $0xd0] sm:$0xff] %vm924_vm1, %v902_v0  ;;  %v894_v28 = vadd.f32 %v1531_v25, %v893_v7 }
 0x2cf   :  { %v1206_v29 = vpop.f32.mrf.mxu0 }
 0x2d0   :  { %949 = vst.msk [vmem:[#allocation10 + $0xc0] sm:$0xff] %vm924_vm1, %v894_v28  ;;  %v905_v30 = vadd.f32 %v1206_v29, %v1531_v25 }
 0x2d1   :  { %v896_v31 = vpop.f32.mrf.mxu0 }
 0x2d2   :  { %952 = vst.msk [vmem:[#allocation10 + $0xd8] sm:$0xff] %vm924_vm1, %v905_v30  ;;  %v897_v32 = vadd.f32 %v1531_v25, %v896_v31 }
 0x2d3   :  { %v1209_v33 = vpop.f32.mrf.mxu0 }
 0x2d4   :  { %950 = vst.msk [vmem:[#allocation10 + $0xc8] sm:$0xff] %vm924_vm1, %v897_v32  ;;  %v918_v34 = vadd.f32 %v1209_v33, %v1531_v25 }
 0x2d5   :  { %v909_v35 = vpop.f32.mrf.mxu0 }
 0x2d6   :  { %955 = vst.msk [vmem:[#allocation10 + $0xf0] sm:$0xff] %vm924_vm1, %v918_v34  ;;  %v910_v36 = vadd.f32 %v1531_v25, %v909_v35 }
 0x2d7   :  { %v1210_v37 = vpop.f32.mrf.mxu0 }
 0x2d8   :  { %953 = vst.msk [vmem:[#allocation10 + $0xe0] sm:$0xff] %vm924_vm1, %v910_v36  ;;  %v921_v16 = vadd.f32 %v1210_v37, %v1531_v25 }
 0x2d9   :  { %v912_v38 = vpop.f32.mrf.mxu0 }
 0x2da   :  { %956 = vst.msk [vmem:[#allocation10 + $0xf8] sm:$0xff] %vm924_vm1, %v921_v16  ;;  %v913_v40 = vadd.f32 %v1531_v25, %v912_v38 }
 0x2dc   :  { %954 = vst.msk [vmem:[#allocation10 + $0xe8] sm:$0xff] %vm924_vm1, %v913_v40 }
 0x2dd   :  { %961 = vsyncadd [#allocation4], 4064  ;;  %s1358_s6 = smov [#allocation10]  }
 0x2de   :  { %s962_s26 = sshll.u32 %s1358_s6, 4  ;;  %s963_s26 = int_to_ptr.vmem [resolvable:$true] %s962_s26 }
 0x2df   :  { %s1322_s27 = scalar_lea.vmem %s963_s26, 32  ;;  %s1326_s28 = scalar_lea.vmem %s963_s26, 4096 }
 0x2e0   :  { %p1323_p6 = scmp.ne.s32.totalorder %s963_s26, %s1322_s27  ;;  %p1327_p7 = scmp.lt.s32.totalorder %s963_s26, %s963_s26 }
 0x2e1   :  { %p1328_p8 = scmp.lt.s32.totalorder %s1326_s28, %s1322_s27 }
 0x2e3   :  { %p1329_p9 = por %p1328_p8, %p1327_p7 }
 0x2e5   :  { %p1330_p10 = pnand %p1329_p9, %p1323_p6 }
 0x2e7   :  { %1333 = shalt.err (!%p1330_p10)
}
 0x2e8   :  { %968 = dma.vmem_to_hbm [thread:$0]  %s963_s26, 32, %s1610_s7, [#allocation4], %s1354_s12, %s1354_s12, %s1355_s13  }
 0x2e9   :  { %1348 = dma.done.wait [#allocation4], 4096  }
 0x2ea   :  { %1349 = vsyncadd [#allocation4], 4294963200 }
 0x2eb   :  { %972 = vsyncpa [#allocation3], 1 }
 0x2ec   :  { %973 = vsyncpa [#allocation6], 1 }
 0x2ed   :  { %974 = vsyncpa [#allocation9], 1 }
 0x2ee   :  { %975 = vsyncpa [#allocation4], 1 }

</bundles_post_ra>
